<compile_context>
chip_gen: v6e
topology: v6e:2x2x1
jax: 0.10.0
libtpu: 0.0.40
codegen_flags: <defaults>
</compile_context>

<pallas_src>
import functools

import jax
import jax.numpy as jnp
from jax.experimental import pallas as pl
from jax.experimental.pallas import tpu as pltpu


def _round_up(x, m):
    return ((x + m - 1) // m) * m


def _offset_head_kernel(x_ref,
                        w1d_ref, b1d_ref,
                        w2_ref, b2_ref,
                        w3_ref, b3_ref,
                        wh_ref, bh_ref,
                        o_ref,
                        *, c_half, compute_dtype):
    """One (batch, point-tile) block: fused MLP + residual downsample + head.

    All tensors are channel-major: activations are (C, tile_n), weights are
    (C_out, C_in), biases are (C_out, 1) broadcast along lanes.
    """
    x = x_ref[0].astype(compute_dtype)                      # (C, tn)

    # Fused stage 1: [mlp.conv1 ; downsample] both read x -> one MXU pass.
    r = jnp.dot(w1d_ref[...], x,
                preferred_element_type=jnp.float32) + b1d_ref[...]   # (C/2+C/8, tn)
    h = jnp.maximum(r[:c_half], 0.0)                        # mlp branch + ReLU
    identity = r[c_half:]                                   # downsample branch (no ReLU)

    # mlp: Conv1d(C/2 -> C/4) + ReLU
    h = jnp.dot(w2_ref[...], h.astype(compute_dtype),
                preferred_element_type=jnp.float32) + b2_ref[...]
    h = jnp.maximum(h, 0.0)
    # mlp: Conv1d(C/4 -> C/8)
    h = jnp.dot(w3_ref[...], h.astype(compute_dtype),
                preferred_element_type=jnp.float32) + b3_ref[...]

    # residual add + ReLU
    out = jnp.maximum(h + identity, 0.0)

    # head: Conv1d(C/8 -> coor_dim)
    y = jnp.dot(wh_ref[...], out.astype(compute_dtype),
                preferred_element_type=jnp.float32) + bh_ref[...]
    o_ref[0] = y.astype(o_ref.dtype)                        # (coor_dim, tn) lane-dense


def offset_head_pallas(x_bcn, params, *, tile_n=512, compute_dtype=jnp.float32):
    """x_bcn: (B, C, N) float32  ->  (B, coor_dim, N) float32."""
    B, C, N = x_bcn.shape
    (w1, b1), (w2, b2), (w3, b3), (wd, bd), (wh, bh) = params
    coor_dim = wh.shape[0]
    c_half = w1.shape[0]          # emb_dim // 2
    c_down = wd.shape[0]          # emb_dim // 8

    # Keep the point axis lane-dense: tile_n is a multiple of 128; pad N if needed.
    tile_n = min(tile_n, _round_up(N, 128))
    n_pad = _round_up(N, tile_n)
    if n_pad != N:
        x_bcn = jnp.pad(x_bcn, ((0, 0), (0, 0), (0, n_pad - N)))

    # Fuse the two stage-1 convs that share x; cast weights to the compute dtype.
    w1d = jnp.concatenate([w1, wd], axis=0).astype(compute_dtype)   # (C/2+C/8, C)
    b1d = jnp.concatenate([b1, bd], axis=0).astype(jnp.float32)     # (C/2+C/8, 1)
    w2c = w2.astype(compute_dtype)
    w3c = w3.astype(compute_dtype)
    whc = wh.astype(compute_dtype)
    b2c = b2.astype(jnp.float32)
    b3c = b3.astype(jnp.float32)
    bhc = bh.astype(jnp.float32)

    itemsize = jnp.dtype(x_bcn.dtype).itemsize
    w_bytes = sum(int(a.size) * jnp.dtype(a.dtype).itemsize
                  for a in (w1d, b1d, w2c, b2c, w3c, b3c, whc, bhc))
    flops = 2 * B * n_pad * (C * (c_half + c_down)
                             + c_half * w2.shape[0]
                             + w2.shape[0] * w3.shape[0]
                             + w3.shape[0] * coor_dim)
    cost = pl.CostEstimate(
        flops=flops,
        transcendentals=0,
        bytes_accessed=B * n_pad * C * itemsize
                       + B * n_pad * coor_dim * itemsize + w_bytes)

    # VMEM budget: double-buffered x/out tiles + resident weights (+ headroom).
    # Sized conservatively so it also fits v7x's 64 MiB physical VMEM.
    tile_bytes = 2 * (C * tile_n * itemsize) + 2 * (coor_dim * tile_n * itemsize)
    vmem_limit = int(min(max(4 * (tile_bytes + w_bytes) + (1 << 20),
                             16 * 1024 * 1024),
                         64 * 1024 * 1024))

    const = lambda shape: pl.BlockSpec(shape, lambda b, n: (0, 0))

    out = pl.pallas_call(
        functools.partial(_offset_head_kernel,
                          c_half=c_half, compute_dtype=compute_dtype),
        out_shape=jax.ShapeDtypeStruct((B, coor_dim, n_pad), x_bcn.dtype),
        grid_spec=pltpu.PrefetchScalarGridSpec(
            num_scalar_prefetch=0,
            grid=(B, n_pad // tile_n),
            in_specs=[
                pl.BlockSpec((1, C, tile_n), lambda b, n: (b, 0, n)),   # x tile (NCW)
                const(w1d.shape), const(b1d.shape),
                const(w2c.shape), const(b2c.shape),
                const(w3c.shape), const(b3c.shape),
                const(whc.shape), const(bhc.shape),
            ],
            out_specs=pl.BlockSpec((1, coor_dim, tile_n), lambda b, n: (b, 0, n)),
        ),
        compiler_params=pltpu.CompilerParams(
            dimension_semantics=("parallel", "parallel"),  # shards across TCs on v7x
            vmem_limit_bytes=vmem_limit),
        cost_estimate=cost,
    )(x_bcn, w1d, b1d, w2c, b2c, w3c, b3c, whc, bhc)

    if n_pad != N:
        out = out[:, :, :N]
    return out


def init_params(key, emb_dim, coor_dim=3):
    """Synthetic weights in PyTorch Conv1d layout: weight (C_out, C_in) (= conv
    weight.squeeze(-1)), bias (C_out, 1)."""
    dims = [
        (emb_dim // 2, emb_dim),        # mlp[0]
        (emb_dim // 4, emb_dim // 2),   # mlp[2]
        (emb_dim // 8, emb_dim // 4),   # mlp[4]
        (emb_dim // 8, emb_dim),        # downsample
        (coor_dim, emb_dim // 8),       # head
    ]
    params = []
    for (cout, cin) in dims:
        key, kw, kb = jax.random.split(key, 3)
        w = jax.random.normal(kw, (cout, cin), jnp.float32) * (1.0 / (cin ** 0.5))
        b = jax.random.normal(kb, (cout, 1), jnp.float32) * 0.01
        params.append((w, b))
    return params


def offset_head_reference(x_bcn, params):
    """Pure-JAX reference of the PyTorch forward (NCW layout, for correctness)."""
    (w1, b1), (w2, b2), (w3, b3), (wd, bd), (wh, bh) = params
    conv = lambda x, w, b: jnp.einsum('oc,bcn->bon', w, x) + b[None]
    h = jax.nn.relu(conv(x_bcn, w1, b1))
    h = jax.nn.relu(conv(h, w2, b2))
    h = conv(h, w3, b3)
    idn = conv(x_bcn, wd, bd)
    out = jax.nn.relu(h + idn)
    return conv(out, wh, bh)                                # (B, coor_dim, N)


if __name__ == "__main__":
    B, emb_dim, N, coor_dim = 2, 32, 512, 3

    key = jax.random.PRNGKey(0)
    key, kx = jax.random.split(key)
    x = jax.random.normal(kx, (B, emb_dim, N), jnp.float32)   # (B, C, N) like PyTorch

    params = init_params(key, emb_dim, coor_dim)

    # compute_dtype=jnp.bfloat16 is available for v6e/v7x MXU/bandwidth gains;
    # the demo stays in float32 to satisfy the 1e-4 check against the reference.
    run = jax.jit(functools.partial(offset_head_pallas, tile_n=512))
    y = jax.block_until_ready(run(x, params))

    y_ref = offset_head_reference(x, params)
    assert y.shape == (B, coor_dim, N)
    assert jnp.allclose(y, y_ref, rtol=1e-4, atol=1e-4)

    print("KERNEL_OK")
</pallas_src>

<mosaic_0001>
module attributes {stable_mosaic.version = 11 : i64} {
  func.func @_offset_head_kernel(%arg0: i32, %arg1: i32, %arg2: memref<1x32x512xf32, #tpu.memory_space<vmem>>, %arg3: memref<20x32xf32, #tpu.memory_space<vmem>>, %arg4: memref<20x1xf32, #tpu.memory_space<vmem>>, %arg5: memref<8x16xf32, #tpu.memory_space<vmem>>, %arg6: memref<8x1xf32, #tpu.memory_space<vmem>>, %arg7: memref<4x8xf32, #tpu.memory_space<vmem>>, %arg8: memref<4x1xf32, #tpu.memory_space<vmem>>, %arg9: memref<3x4xf32, #tpu.memory_space<vmem>>, %arg10: memref<3x1xf32, #tpu.memory_space<vmem>>, %arg11: memref<1x3x512xf32, #tpu.memory_space<vmem>>) attributes {dimension_semantics = [#tpu.dimension_semantics<parallel>, #tpu.dimension_semantics<parallel>], iteration_bounds = array<i64: 2, 1>, scalar_prefetch = 0 : i64, scratch_operands = 0 : i64, tpu.core_type = #tpu.core_type<tc>, window_params = [{transform_indices = @transform_0, window_bounds = array<i64: 1, 32, 512>}, {pipeline_mode = #tpu.pipeline_mode<synchronous>, transform_indices = @transform_1, window_bounds = array<i64: 20, 32>}, {pipeline_mode = #tpu.pipeline_mode<synchronous>, transform_indices = @transform_2, window_bounds = array<i64: 20, 1>}, {pipeline_mode = #tpu.pipeline_mode<synchronous>, transform_indices = @transform_3, window_bounds = array<i64: 8, 16>}, {pipeline_mode = #tpu.pipeline_mode<synchronous>, transform_indices = @transform_4, window_bounds = array<i64: 8, 1>}, {pipeline_mode = #tpu.pipeline_mode<synchronous>, transform_indices = @transform_5, window_bounds = array<i64: 4, 8>}, {pipeline_mode = #tpu.pipeline_mode<synchronous>, transform_indices = @transform_6, window_bounds = array<i64: 4, 1>}, {pipeline_mode = #tpu.pipeline_mode<synchronous>, transform_indices = @transform_7, window_bounds = array<i64: 3, 4>}, {pipeline_mode = #tpu.pipeline_mode<synchronous>, transform_indices = @transform_8, window_bounds = array<i64: 3, 1>}, {transform_indices = @transform_9, window_bounds = array<i64: 1, 3, 512>}]} {
    %c0 = arith.constant 0 : index
    %c0_0 = arith.constant 0 : index
    %c0_1 = arith.constant 0 : index
    %0 = vector.load %arg2[%c0, %c0_0, %c0_1] : memref<1x32x512xf32, #tpu.memory_space<vmem>>, vector<1x32x512xf32>
    %1 = vector.shape_cast %0 : vector<1x32x512xf32> to vector<32x512xf32>
    %c0_2 = arith.constant 0 : index
    %c0_3 = arith.constant 0 : index
    %2 = vector.load %arg3[%c0_2, %c0_3] : memref<20x32xf32, #tpu.memory_space<vmem>>, vector<20x32xf32>
    %cst = arith.constant dense<0.000000e+00> : vector<20x512xf32>
    %3 = tpu.matmul %2, %1, %cst {dimension_numbers = #tpu.dot_dimension_numbers<[1], [0], [0], [1], [0, 0, 1, 1], [], []>} : vector<20x32xf32>, vector<32x512xf32>, vector<20x512xf32> -> vector<20x512xf32>
    %c0_4 = arith.constant 0 : index
    %c0_5 = arith.constant 0 : index
    %4 = vector.load %arg4[%c0_4, %c0_5] : memref<20x1xf32, #tpu.memory_space<vmem>>, vector<20x1xf32>
    %5 = vector.broadcast %4 : vector<20x1xf32> to vector<20x512xf32>
    %6 = arith.addf %3, %5 : vector<20x512xf32>
    %7 = vector.extract_strided_slice %6 {offsets = [0, 0], sizes = [16, 512], strides = [1, 1]} : vector<20x512xf32> to vector<16x512xf32>
    %cst_6 = arith.constant 0.000000e+00 : f32
    %8 = vector.broadcast %cst_6 : f32 to vector<16x512xf32>
    %9 = arith.maximumf %7, %8 : vector<16x512xf32>
    %10 = vector.extract_strided_slice %6 {offsets = [16, 0], sizes = [4, 512], strides = [1, 1]} : vector<20x512xf32> to vector<4x512xf32>
    %c0_7 = arith.constant 0 : index
    %c0_8 = arith.constant 0 : index
    %11 = vector.load %arg5[%c0_7, %c0_8] : memref<8x16xf32, #tpu.memory_space<vmem>>, vector<8x16xf32>
    %cst_9 = arith.constant dense<0.000000e+00> : vector<8x512xf32>
    %12 = tpu.matmul %11, %9, %cst_9 {dimension_numbers = #tpu.dot_dimension_numbers<[1], [0], [0], [1], [0, 0, 1, 1], [], []>} : vector<8x16xf32>, vector<16x512xf32>, vector<8x512xf32> -> vector<8x512xf32>
    %c0_10 = arith.constant 0 : index
    %c0_11 = arith.constant 0 : index
    %13 = vector.load %arg6[%c0_10, %c0_11] : memref<8x1xf32, #tpu.memory_space<vmem>>, vector<8x1xf32>
    %14 = vector.broadcast %13 : vector<8x1xf32> to vector<8x512xf32>
    %15 = arith.addf %12, %14 : vector<8x512xf32>
    %cst_12 = arith.constant 0.000000e+00 : f32
    %16 = vector.broadcast %cst_12 : f32 to vector<8x512xf32>
    %17 = arith.maximumf %15, %16 : vector<8x512xf32>
    %c0_13 = arith.constant 0 : index
    %c0_14 = arith.constant 0 : index
    %18 = vector.load %arg7[%c0_13, %c0_14] : memref<4x8xf32, #tpu.memory_space<vmem>>, vector<4x8xf32>
    %cst_15 = arith.constant dense<0.000000e+00> : vector<4x512xf32>
    %19 = tpu.matmul %18, %17, %cst_15 {dimension_numbers = #tpu.dot_dimension_numbers<[1], [0], [0], [1], [0, 0, 1, 1], [], []>} : vector<4x8xf32>, vector<8x512xf32>, vector<4x512xf32> -> vector<4x512xf32>
    %c0_16 = arith.constant 0 : index
    %c0_17 = arith.constant 0 : index
    %20 = vector.load %arg8[%c0_16, %c0_17] : memref<4x1xf32, #tpu.memory_space<vmem>>, vector<4x1xf32>
    %21 = vector.broadcast %20 : vector<4x1xf32> to vector<4x512xf32>
    %22 = arith.addf %19, %21 : vector<4x512xf32>
    %23 = arith.addf %22, %10 : vector<4x512xf32>
    %cst_18 = arith.constant 0.000000e+00 : f32
    %24 = vector.broadcast %cst_18 : f32 to vector<4x512xf32>
    %25 = arith.maximumf %23, %24 : vector<4x512xf32>
    %c0_19 = arith.constant 0 : index
    %c0_20 = arith.constant 0 : index
    %26 = vector.load %arg9[%c0_19, %c0_20] : memref<3x4xf32, #tpu.memory_space<vmem>>, vector<3x4xf32>
    %cst_21 = arith.constant dense<0.000000e+00> : vector<3x512xf32>
    %27 = tpu.matmul %26, %25, %cst_21 {dimension_numbers = #tpu.dot_dimension_numbers<[1], [0], [0], [1], [0, 0, 1, 1], [], []>} : vector<3x4xf32>, vector<4x512xf32>, vector<3x512xf32> -> vector<3x512xf32>
    %c0_22 = arith.constant 0 : index
    %c0_23 = arith.constant 0 : index
    %28 = vector.load %arg10[%c0_22, %c0_23] : memref<3x1xf32, #tpu.memory_space<vmem>>, vector<3x1xf32>
    %29 = vector.broadcast %28 : vector<3x1xf32> to vector<3x512xf32>
    %30 = arith.addf %27, %29 : vector<3x512xf32>
    %c0_24 = arith.constant 0 : index
    %c0_25 = arith.constant 0 : index
    %c0_26 = arith.constant 0 : index
    %31 = vector.load %arg11[%c0_24, %c0_25, %c0_26] : memref<1x3x512xf32, #tpu.memory_space<vmem>>, vector<1x3x512xf32>
    %32 = vector.shape_cast %31 : vector<1x3x512xf32> to vector<3x512xf32>
    %33 = vector.shape_cast %30 : vector<3x512xf32> to vector<1x3x512xf32>
    tpu.vector_store %arg11[%c0_24, %c0_25, %c0_26], %33 {strides = array<i32>} : memref<1x3x512xf32, #tpu.memory_space<vmem>>, vector<1x3x512xf32>,
    return
  }
  func.func @transform_0(%arg0: i32, %arg1: i32) -> (i32, i32, i32) {
    %c0_i32 = arith.constant 0 : i32
    %c0_i32_0 = arith.constant 0 : i32
    return %arg0, %c0_i32, %arg1 : i32, i32, i32
  }
  func.func @transform_1(%arg0: i32, %arg1: i32) -> (i32, i32) {
    %c0_i32 = arith.constant 0 : i32
    %c0_i32_0 = arith.constant 0 : i32
    %c0_i32_1 = arith.constant 0 : i32
    return %c0_i32, %c0_i32_0 : i32, i32
  }
  func.func @transform_2(%arg0: i32, %arg1: i32) -> (i32, i32) {
    %c0_i32 = arith.constant 0 : i32
    %c0_i32_0 = arith.constant 0 : i32
    %c0_i32_1 = arith.constant 0 : i32
    return %c0_i32, %c0_i32_0 : i32, i32
  }
  func.func @transform_3(%arg0: i32, %arg1: i32) -> (i32, i32) {
    %c0_i32 = arith.constant 0 : i32
    %c0_i32_0 = arith.constant 0 : i32
    %c0_i32_1 = arith.constant 0 : i32
    return %c0_i32, %c0_i32_0 : i32, i32
  }
  func.func @transform_4(%arg0: i32, %arg1: i32) -> (i32, i32) {
    %c0_i32 = arith.constant 0 : i32
    %c0_i32_0 = arith.constant 0 : i32
    %c0_i32_1 = arith.constant 0 : i32
    return %c0_i32, %c0_i32_0 : i32, i32
  }
  func.func @transform_5(%arg0: i32, %arg1: i32) -> (i32, i32) {
    %c0_i32 = arith.constant 0 : i32
    %c0_i32_0 = arith.constant 0 : i32
    %c0_i32_1 = arith.constant 0 : i32
    return %c0_i32, %c0_i32_0 : i32, i32
  }
  func.func @transform_6(%arg0: i32, %arg1: i32) -> (i32, i32) {
    %c0_i32 = arith.constant 0 : i32
    %c0_i32_0 = arith.constant 0 : i32
    %c0_i32_1 = arith.constant 0 : i32
    return %c0_i32, %c0_i32_0 : i32, i32
  }
  func.func @transform_7(%arg0: i32, %arg1: i32) -> (i32, i32) {
    %c0_i32 = arith.constant 0 : i32
    %c0_i32_0 = arith.constant 0 : i32
    %c0_i32_1 = arith.constant 0 : i32
    return %c0_i32, %c0_i32_0 : i32, i32
  }
  func.func @transform_8(%arg0: i32, %arg1: i32) -> (i32, i32) {
    %c0_i32 = arith.constant 0 : i32
    %c0_i32_0 = arith.constant 0 : i32
    %c0_i32_1 = arith.constant 0 : i32
    return %c0_i32, %c0_i32_0 : i32, i32
  }
  func.func @transform_9(%arg0: i32, %arg1: i32) -> (i32, i32, i32) {
    %c0_i32 = arith.constant 0 : i32
    %c0_i32_0 = arith.constant 0 : i32
    return %arg0, %c0_i32, %arg1 : i32, i32, i32
  }
}

</mosaic_0001>

<bundles_post_ra>
// kernel: offset_head_pallas.1
= control target key start
LH: loop header
LB: loop body
LE: loop exit
PB: predicated region body
PF: predicated region fallthrough
CT: control target
= control target key end

     0   :  { %14 = vsyncpa [#allocation3], 0  ;;  %s1586_s0 = inlined_call_operand.hbm [shape: f32[2,32,512], index: 0, kind: input, shape index: {}]   ;;  %s1587_s1 = inlined_call_operand.vmem [shape: f32[20,32], index: 1, kind: input, shape index: {}]   ;;  %s1588_s2 = inlined_call_operand.vmem [shape: f32[20,1], index: 2, kind: input, shape index: {}]   ;;  %s1589_s3 = inlined_call_operand.vmem [shape: f32[8,16], index: 3, kind: input, shape index: {}]   ;;  %s1590_s4 = inlined_call_operand.vmem [shape: f32[8,1], index: 4, kind: input, shape index: {}]   ;;  %s1591_s5 = inlined_call_operand.vmem [shape: f32[4,8], index: 5, kind: input, shape index: {}]   ;;  %s1592_s6 = inlined_call_operand.vmem [shape: f32[4,1], index: 6, kind: input, shape index: {}]   ;;  %s1593_s7 = inlined_call_operand.vmem [shape: f32[3,4], index: 7, kind: input, shape index: {}]   ;;  %s1594_s8 = inlined_call_operand.vmem [shape: f32[3,1], index: 8, kind: input, shape index: {}]   ;;  %s1595_s9 = inlined_call_operand.vmem [shape: f32[2,3,512], index: 9, kind: output, shape index: {}]  }
   0x1   :  { %16 = vsyncpa [#allocation3 + $0x1], 0  ;;  %s1418_s30 = smov 0   ;;  %s1420_s10 = smov 0  }
   0x2   :  { %s1422_s11 = smov 0   ;;  %s1424_s12 = smov 0  }
   0x3   :  { %s1426_s13 = smov 0   ;;  %s1428_s14 = smov 0  }
   0x4 LB: > { %s1191_s15 = sadd.s32 4294967295, %s1361_s14   ;;  %s34_s16 = sadd.s32 1, %s1357_s13  ;;  %s1361_s14 = sphi %s1428_s14, %s22_s14   ;;  %s1357_s13 = sphi %s1426_s13, %s1606_s13   ;;  %s1353_s12 = sphi %s1424_s12, %s1605_s12   ;;  %s1349_s11 = sphi %s1422_s11, %s1604_s11   ;;  %s1345_s10 = sphi %s1420_s10, %s1603_s10   ;;  %s1341_s30 = sphi %s1418_s30, %s1602_s30  }
   0x5   : > { %p36_p0 = scmp.ge.s32.totalorder %s34_s16, 2  ;;  %s43_s17 = sadd.s32 1, %s1349_s11 }
   0x6   : > { %p50_p1 = scmp.ne.s32.totalorder %s1349_s11, %s1345_s10  ;;  %p51_p2 = scmp.eq.s32.totalorder %s1361_s14, 0 }
   0x7   : > { %s1608_s16 = smov (%p36_p0, %s34_s16), 0  ;;  %p56_p4 = scmp.ne.s32.totalorder %s1345_s10, %s1341_s30 }
   0x8   : > { %1597 = sst [smem:[#allocation5_spill]] %s1608_s16  ;;  %p1454_p3 = por %p51_p2, %p50_p1 }
   0x9   : > { %s38_s19 = ssub.s32 %s1357_s13, %s1608_s16  ;;  %p57_p5 = scmp.eq.s32.totalorder %s1191_s15, 0 }
   0xa   : > { %p41_p6 = scmp.eq.s32.totalorder %s38_s19, 0  ;;  %p1228_p8 = scmp.lt.s32.totalorder %s1361_s14, 2 }
   0xb   : > { %p1461_p7 = por %p57_p5, %p56_p4  ;;  %s300_s22 = sand.u32 1, %s1349_s11  }
   0xc   : > { %s1467_s21 = scalar_select %p41_p6, %s1349_s11, %s43_s17  }
   0xd   : > { %s1220_s23 = sshll.u32 %s1357_s13, 11  ;;  %s1195_s24 = sshll.u32 %s300_s22, 7 }
   0xe   : > { %s312_s27 = scalar_lea.hbm %s1586_s0, %s1220_s23  ;;  %s304_s28 = scalar_lea.vmem [#allocation2], %s1195_s24 }
   0xf   : > { %s313_s29 = sshll.u32 %s304_s28, 4  ;;  %p1476_p9 = pnand %p1228_p8, %p1454_p3  ;;  %s314_s29 = int_to_ptr.vmem [resolvable:$true] %s313_s29 }
  0x10   : > { %s301_s15 = scalar_lea.sflag [#allocation3], %s300_s22  ;;  %s1296_s17 = scalar_lea.vmem %s314_s29, 2048 }
  0x11   : > { %p1285_p10 = pneg %p1476_p9  ;;  %p1297_p11 = scmp.ne.s32.totalorder %s314_s29, %s1296_s17 }
  0x12   : > { %s1363_s19 = smov [#allocation2]  }
  0x13   : > { %p1299_p12 = pnand %p1297_p11, %p1285_p10  ;;  %s1301_s16 = sshll.u32 %s1363_s19, 4  ;;  %s1302_s16 = int_to_ptr.vmem [resolvable:$false] %s1301_s16 }
  0x14   : > { %s1303_s23 = scalar_lea.vmem %s1302_s16, 4096  ;;  %p1304_p0 = scmp.lt.s32.totalorder %s314_s29, %s1302_s16 }
  0x15   : > { %p1300_p13 = pneg %p1299_p12  ;;  %p1305_p1 = scmp.lt.s32.totalorder %s1303_s23, %s1296_s17 }
  0x17   : > { %p1306_p2 = por %p1305_p1, %p1304_p0 }
  0x19   : > { %p1307_p3 = pnand %p1306_p2, %p1300_p13 }
  0x1b   : > { %1310 = shalt.err (!%p1307_p3)
}
  0x1c   : > { %s1364_s18 = smov 512   ;;  %s1365_s22 = smov 32  }
  0x1d   : > { %1227 = dma.hbm_to_vmem [thread:$0]  (!%p1476_p9), %s312_s27, 2048, %s314_s29, %s301_s15, %s1364_s18, %s1364_s18, %s1365_s22  }
  0x1e   : > { %p1198_p4 = scmp.ge.s32.totalorder %s1361_s14, 1  ;;  %p321_p5 = scmp.lt.s32.totalorder %s1361_s14, 3 }
  0x20   : > { %p322_p6 = pnand %p1198_p4, %p321_p5 }
  0x21   : > { %s327_s24 = sand.u32 (!%p322_p6), 1, %s1345_s10  }
  0x22   : > { %325 = sbr.rel (%p322_p6) target bundleno = 862 (0x35e), region = 56  ;;  %s1199_s25 = sshll.u32 (!%p322_p6), %s327_s24, 7 }
  0x23   : > { %s328_s16 = scalar_lea.sflag (!%p322_p6), [#allocation3], %s327_s24  ;;  %s1487_s26 = scalar_lea.vmem (!%p322_p6), [#allocation2], %s1199_s25 }
  0x27   : > { %1336 = dma.done.wait (%p1461_p7), %s328_s16, 2048  }
  0x28   : > { %1338 = vsyncadd (%p1461_p7), %s328_s16, 4294965248  ;;  %v1366_v0 = vmov 0.0   ;;  %v1367_v1 = vmov 0   ;;  %v394_v2 = vld [vmem:[%s1487_s26 + $0x68] sm:$0xff]  ;;  %v396_v3 = vld [vmem:[%s1487_s26 + $0x78] sm:$0xff]  ;;  %vm418_vm0 = vcmask 261120  }
  0x29   : > { %492 = vmatprep.mubr.f32.mxu0 %v1366_v0  ;;  %575 = vmatprep.mubr.f32.mxu1 %v1366_v0  ;;  %v393_v4 = vld [vmem:[%s1487_s26 + $0x60] sm:$0xff]  ;;  %v395_v5 = vld [vmem:[%s1487_s26 + $0x70] sm:$0xff]  ;;  %v390_v6 = vld [vmem:[%s1487_s26 + $0x48] sm:$0xff]  ;;  %vm609_vm1 = vcmask 130048   ;;  %vm766_vm2 = vcmask 64512   ;;  %vm931_vm3 = vcmask 1043456  }
  0x2a   : > { %1281 = vset.pattern.permute.xlu0 %v1367_v1  ;;  %1282 = vset.pattern.permute.xlu1 %v1367_v1  ;;  %v392_v7 = vld [vmem:[%s1487_s26 + $0x58] sm:$0xff]  ;;  %v389_v8 = vld [vmem:[%s1487_s26 + $0x40] sm:$0xff]  ;;  %v391_v9 = vld [vmem:[%s1487_s26 + $0x50] sm:$0xff]  ;;  %vm927_vm4 = vcmask 31744   ;;  %p372_p7 = scmp.lt.s32.totalorder %s1353_s12, 1 }
  0x2b   : > { %452 = vmatprep.subr.mxu0 %v394_v2  ;;  %535 = vmatprep.subr.mxu1 %v396_v3  ;;  %v386_v10 = vld [vmem:[%s1487_s26 + $0x28] sm:$0xff]  ;;  %v388_v11 = vld [vmem:[%s1487_s26 + $0x38] sm:$0xff]  ;;  %v385_v12 = vld [vmem:[%s1487_s26 + $0x20] sm:$0xff] }
  0x2c   : > { %453 = vmatpush1.msra.mxu0 %v393_v4  ;;  %536 = vmatpush1.msra.mxu1 %v395_v5  ;;  %v387_v13 = vld [vmem:[%s1487_s26 + $0x30] sm:$0xff]  ;;  %v382_v14 = vld [vmem:[%s1487_s26 + $0x8] sm:$0xff]  ;;  %v384_v15 = vld [vmem:[%s1487_s26 + $0x18] sm:$0xff]  ;;  %s1610_s12 = smov (!%p372_p7, %s1353_s12), 1 }
  0x2d   : > { %454 = vmatprep.subr.mxu0 %v390_v6  ;;  %537 = vmatprep.subr.mxu1 %v392_v7  ;;  %v381_v16 = vld [vmem:[%s1487_s26] sm:$0xff]  ;;  %v383_v17 = vld [vmem:[%s1487_s26 + $0x10] sm:$0xff]  ;;  %v401_v19 = vld [vmem:[%s1588_s2 + $0x8] sm:$0xff]  ;;  %s1221_s18 = sshll.u32 %s1610_s12, 4 }
  0x2e   : > { %455 = vmatpush1.msra.mxu0 %v389_v8  ;;  %538 = vmatpush1.msra.mxu1 %v391_v9  ;;  %v397_v18 = vld [vmem:[%s1587_s1] sm:$0xff]  ;;  %v398_v20 = vld [vmem:[%s1587_s1 + $0x8] sm:$0xff]  ;;  %v399_v23 = vld [vmem:[%s1587_s1 + $0x10] sm:$0xf]  ;;  %s379_s25 = scalar_lea.vmem %s1595_s9, %s1221_s18 }
  0x2f   : > { %456 = vmatprep.subr.mxu0 %v386_v10  ;;  %539 = vmatprep.subr.mxu1 %v388_v11  ;;  %v400_v21 = vld [vmem:[%s1588_s2] sm:$0xff]  ;;  %v402_v25 = vld [vmem:[%s1588_s2 + $0x10] sm:$0xf] }
  0x30   : > { %457 = vmatpush1.msra.mxu0 %v385_v12  ;;  %540 = vmatpush1.msra.mxu1 %v387_v13  ;;  %v760_v22 = vld [vmem:[%s1592_s6] sm:$0xf] }
  0x31   : > { %458 = vmatprep.subr.mxu0 %v382_v14  ;;  %541 = vmatprep.subr.mxu1 %v384_v15  ;;  %v603_v24 = vld [vmem:[%s1590_s4] sm:$0xff] }
  0x32   : > { %459 = vmatpush1.msra.mxu0 %v381_v16  ;;  %542 = vmatpush1.msra.mxu1 %v383_v17  ;;  %v921_v26 = vld [vmem:[%s1594_s8] sm:$0x7] }
  0x33   : > { %1202 = vmatmul.mubr.msk.f32.vlgmr.msra.gmra.mxu0 %vm418_vm0, %v397_v18  ;;  %1205 = vmatmul.mubr.msk.f32.vlgmr.msra.gmra.mxu1 %vm418_vm0, %v397_v18  ;;  %v602_v53 = vld [vmem:[%s1589_s3] sm:$0xff] }
  0x34   : > { %498 = vmatprep.mubr.f32.mxu0 %v1366_v0  ;;  %581 = vmatprep.mubr.f32.mxu1 %v1366_v0  ;;  %v759_v8 = vld [vmem:[%s1591_s5] sm:$0xf] }
  0x35   : > { %410 = vperm.xlu0 %1281, %v401_v19   ;;  %606 = vperm.xlu1 %1282, %v603_v24  }
  0x37   : > { %1203 = vmatmul.mubr.msk.f32.gmra.mxu0 %vm418_vm0, %v398_v20  ;;  %1206 = vmatmul.mubr.msk.f32.gmra.mxu1 %vm418_vm0, %v398_v20 }
  0x38   : > { %504 = vmatprep.mubr.f32.mxu0 %v1366_v0  ;;  %587 = vmatprep.mubr.f32.mxu1 %v1366_v0 }
  0x39   : > { %405 = vperm.xlu0 %1281, %v400_v21   ;;  %415 = vperm.xlu1 %1282, %v402_v25  }
  0x3b   : > { %1204 = vmatmul.mubr.msk.f32.gmra.mxu0 %vm418_vm0, %v399_v23  ;;  %1207 = vmatmul.mubr.msk.f32.gmra.mxu1 %vm418_vm0, %v399_v23 }
  0x3c   : > { %677 = vmatprep.mubr.f32.mxu0 %v1366_v0  ;;  %748 = vmatprep.mubr.f32.mxu1 %v1366_v0 }
  0x3d   : > { %763 = vperm.xlu0 %1281, %v760_v22   ;;  %924 = vperm.xlu1 %1282, %v921_v26  }
  0xb0   : > { %v411_v27 = vpop.permute.xlu0 %410  ;;  %v607_v60 = vpop.permute.xlu1 %606 }
  0xb4   : > { %v406_v34 = vpop.permute.xlu0 %405  ;;  %v416_v10 = vpop.permute.xlu1 %415 }
  0xb8   : > { %v764_v9 = vpop.permute.xlu0 %763 }
  0xf3   : > { %v494_v28 = vpop.f32.mrf.mxu0  ;;  %v577_v29 = vpop.f32.mrf.mxu1 }
  0xf4   : > { %v495_v43 = vadd.f32 %v494_v28, %v406_v34  ;;  %v578_v44 = vadd.f32 %v577_v29, %v406_v34 }
  0xf5   : > { %v496_v30 = vpop.f32.mrf.mxu0  ;;  %v579_v31 = vpop.f32.mrf.mxu1 }
  0xf6   : > { %v497_v39 = vadd.f32 %v496_v30, %v406_v34  ;;  %v580_v40 = vadd.f32 %v579_v31, %v406_v34  ;;  %v594_v51 = vmax.f32 %v495_v43, 0.0  ;;  %v596_v52 = vmax.f32 %v578_v44, 0.0  ;;  %v920_v30 = vld [vmem:[%s1593_s7] sm:$0x7] }
  0xf7   : > { %v500_v32 = vpop.f32.mrf.mxu0  ;;  %v583_v33 = vpop.f32.mrf.mxu1 }
  0xf8   : > { %v501_v35 = vadd.f32 %v500_v32, %v411_v27  ;;  %v584_v36 = vadd.f32 %v583_v33, %v411_v27  ;;  %v595_v49 = vmax.f32 %v497_v39, 0.0  ;;  %v597_v50 = vmax.f32 %v580_v40, 0.0  ;;  %v925_v33 = vpop.permute.xlu1 %924 }
  0xf9   : > { %v502_v37 = vpop.f32.mrf.mxu0  ;;  %v585_v38 = vpop.f32.mrf.mxu1 }
  0xfa   : > { %v503_v41 = vadd.f32 %v502_v37, %v411_v27  ;;  %v586_v42 = vadd.f32 %v585_v38, %v411_v27  ;;  %v598_v47 = vmax.f32 %v501_v35, 0.0  ;;  %v600_v48 = vmax.f32 %v584_v36, 0.0 }
  0xfb   : > { %v506_v54 = vpop.f32.mrf.mxu0  ;;  %v589_v55 = vpop.f32.mrf.mxu1 }
  0xfc   : > { %v599_v45 = vmax.f32 %v503_v41, 0.0  ;;  %v601_v46 = vmax.f32 %v586_v42, 0.0  ;;  %v507_v15 = vadd.f32 %v506_v54, %v416_v10  ;;  %v590_v16 = vadd.f32 %v589_v55, %v416_v10 }
  0xfd   : > { %v508_v56 = vpop.f32.mrf.mxu0  ;;  %v591_v57 = vpop.f32.mrf.mxu1 }
  0xfe   : > { %641 = vmatprep.subr.mxu0 %v599_v45  ;;  %712 = vmatprep.subr.mxu1 %v601_v46  ;;  %v509_v19 = vadd.f32 %v508_v56, %v416_v10  ;;  %v592_v21 = vadd.f32 %v591_v57, %v416_v10 }
  0xff   : > { %642 = vmatpush1.msra.mxu0 %v598_v47  ;;  %713 = vmatpush1.msra.mxu1 %v600_v48 }
 0x100   : > { %643 = vmatprep.subr.mxu0 %v595_v49  ;;  %714 = vmatprep.subr.mxu1 %v597_v50 }
 0x101   : > { %644 = vmatpush1.msra.mxu0 %v594_v51  ;;  %715 = vmatpush1.msra.mxu1 %v596_v52 }
 0x102   : > { %1208 = vmatmul.mubr.msk.f32.vlgmr.msra.gmra.mxu0 %vm609_vm1, %v602_v53  ;;  %1209 = vmatmul.mubr.msk.f32.vlgmr.msra.gmra.mxu1 %vm609_vm1, %v602_v53 }
 0x103   : > { %834 = vmatprep.mubr.f32.mxu0 %v1366_v0  ;;  %905 = vmatprep.mubr.f32.mxu1 %v1366_v0 }
 0x1c2   : > { %v679_v58 = vpop.f32.mrf.mxu0  ;;  %v750_v59 = vpop.f32.mrf.mxu1 }
 0x1c3   : > { %v680_v61 = vadd.f32 %v679_v58, %v607_v60  ;;  %v751_v62 = vadd.f32 %v750_v59, %v607_v60 }
 0x1c4   : > { %v681_v63 = vpop.f32.mrf.mxu0  ;;  %v752_v1 = vpop.f32.mrf.mxu1 }
 0x1c5   : > { %v682_v2 = vadd.f32 %v681_v63, %v607_v60  ;;  %v753_v3 = vadd.f32 %v752_v1, %v607_v60  ;;  %v755_v6 = vmax.f32 %v680_v61, 0.0  ;;  %v757_v7 = vmax.f32 %v751_v62, 0.0 }
 0x1c7   : > { %v756_v4 = vmax.f32 %v682_v2, 0.0  ;;  %v758_v5 = vmax.f32 %v753_v3, 0.0 }
 0x1c9   : > { %800 = vmatprep.subr.mxu0 %v756_v4  ;;  %871 = vmatprep.subr.mxu1 %v758_v5 }
 0x1ca   : > { %801 = vmatpush1.msra.mxu0 %v755_v6  ;;  %872 = vmatpush1.msra.mxu1 %v757_v7 }
 0x1cb   : > { %1210 = vmatmul.mubr.msk.f32.vlgmr.msra.gmra.mxu0 %vm766_vm2, %v759_v8  ;;  %1211 = vmatmul.mubr.msk.f32.vlgmr.msra.gmra.mxu1 %vm766_vm2, %v759_v8 }
 0x1cc   : > { %1008 = vmatprep.mubr.f32.mxu0 %v1366_v0  ;;  %1079 = vmatprep.mubr.f32.mxu1 %v1366_v0 }
 0x28b   : > { %v836_v11 = vpop.f32.mrf.mxu0  ;;  %v907_v12 = vpop.f32.mrf.mxu1 }
 0x28c   : > { %v837_v13 = vadd.f32 %v836_v11, %v764_v9  ;;  %v908_v14 = vadd.f32 %v907_v12, %v764_v9 }
 0x28d   : > { %v838_v17 = vpop.f32.mrf.mxu0  ;;  %v909_v18 = vpop.f32.mrf.mxu1 }
 0x28e   : > { %v839_v20 = vadd.f32 %v838_v17, %v764_v9  ;;  %v910_v22 = vadd.f32 %v909_v18, %v764_v9  ;;  %v912_v23 = vadd.f32 %v837_v13, %v507_v15  ;;  %v914_v24 = vadd.f32 %v908_v14, %v590_v16 }
 0x290   : > { %v913_v25 = vadd.f32 %v839_v20, %v509_v19  ;;  %v915_v0 = vadd.f32 %v910_v22, %v592_v21  ;;  %v916_v28 = vmax.f32 %v912_v23, 0.0  ;;  %v918_v29 = vmax.f32 %v914_v24, 0.0 }
 0x292   : > { %v917_v26 = vmax.f32 %v913_v25, 0.0  ;;  %v919_v27 = vmax.f32 %v915_v0, 0.0 }
 0x294   : > { %1212 = vmatprep.subr.msk.mxu0 %vm931_vm3, %v917_v26  ;;  %1215 = vmatprep.subr.msk.mxu1 %vm931_vm3, %v919_v27 }
 0x295   : > { %1213 = vmatpush1.msk.msra.mxu0 %vm931_vm3, %v916_v28  ;;  %1216 = vmatpush1.msk.msra.mxu1 %vm931_vm3, %v918_v29 }
 0x296   : > { %1214 = vmatmul.mubr.msk.f32.vlgmr.msra.gmra.mxu0 %vm927_vm4, %v920_v30  ;;  %1217 = vmatmul.mubr.msk.f32.vlgmr.msra.gmra.mxu1 %vm927_vm4, %v920_v30 }
 0x356   : > { %v1010_v31 = vpop.f32.mrf.mxu0  ;;  %v1081_v32 = vpop.f32.mrf.mxu1 }
 0x357   : > { %v1011_v36 = vadd.f32 %v1010_v31, %v925_v33  ;;  %v1082_v37 = vadd.f32 %v1081_v32, %v925_v33 }
 0x358   : > { %v1012_v34 = vpop.f32.mrf.mxu0  ;;  %v1083_v35 = vpop.f32.mrf.mxu1 }
 0x359   : > { %v1013_v38 = vadd.f32 %v1012_v34, %v925_v33  ;;  %v1084_v39 = vadd.f32 %v1083_v35, %v925_v33 }
 0x35b   : > { %v1090_v40 = vcombine.low %v1011_v36, %v1013_v38  ;;  %v1091_v41 = vcombine.low %v1082_v37, %v1084_v39 }
 0x35d   : > { %1094 = vst [vmem:[%s379_s25] sm:$0x77] %v1090_v40  ;;  %1095 = vst [vmem:[%s379_s25 + $0x8] sm:$0x77] %v1091_v41 }
 0x35e PF: > { %s22_s14 = sadd.s32 1, %s1361_s14   ;;  %s1601_s16 = sld [smem:[#allocation5_spill]] }
 0x35f   : > { %p19_p8 = scmp.ge.s32.totalorder %s22_s14, 4   ;;  %s1602_s30 = smov %s1345_s10 }
 0x360   : > { %s1603_s10 = smov %s1349_s11  ;;  %s1604_s11 = smov %s1467_s21 }
 0x361   : > { %s1605_s12 = smov %s1357_s13  ;;  %21 = sbr.rel (!%p19_p8) target bundleno = 4 (0x4), region = 96 }
 0x364   : > { %s1606_s13 = smov %s1601_s16 }
 0x366   :  { %1126 = vsyncpa [#allocation3], 1 }
 0x367   :  { %1128 = vsyncpa [#allocation3 + $0x1], 1 }

</bundles_post_ra>
